<compile_context>
chip_gen: v5e
topology: v5e:2x2
jax: 0.10.0
libtpu: 0.0.40
codegen_flags: <defaults>
</compile_context>

<pallas_src>
import functools

import jax
import jax.numpy as jnp
from jax.experimental import pallas as pl
from jax.experimental.pallas import tpu as pltpu

_LANE = 128   # lane width / padding target for narrow dims


def _round_up(n, m):
    return ((n + m - 1) // m) * m


def _choose_tb(B):
    """Adaptive batch tile: small batches get just-enough rows (multiple of 16
    for bf16 sublane packing), mid batches keep >=2 tiles for megacore
    sharding, large batches use 512-row tiles to amortize grid-step overhead."""
    b16 = _round_up(max(B, 1), 16)
    if b16 <= 128:
        return b16
    if b16 <= 1024:
        return 128
    return 512


def _ae_kernel(x_ref, w1_ref, b1_ref, w2_ref, b2_ref,
               w3_ref, b3_ref, w4_ref, b4_ref,
               out_ref, lat_ref):
    # x tile: (TB, Dp) bf16.  Weights (bf16) / biases (f32) are VMEM-resident.
    x = x_ref[...]

    # ----- encoder -----
    h1 = jnp.dot(x, w1_ref[...], preferred_element_type=jnp.float32) + b1_ref[...]
    h1 = jnp.maximum(h1, 0.0)
    # TODO(synk): nn.Dropout is identity in eval mode; training-mode dropout not applied.
    z = jnp.dot(h1.astype(jnp.bfloat16), w2_ref[...],
                preferred_element_type=jnp.float32) + b2_ref[...]
    z = jnp.maximum(z, 0.0)
    lat_ref[...] = z.astype(lat_ref.dtype)

    # ----- decoder -----
    h2 = jnp.dot(z.astype(jnp.bfloat16), w3_ref[...],
                 preferred_element_type=jnp.float32) + b3_ref[...]
    h2 = jnp.maximum(h2, 0.0)
    o = jnp.dot(h2.astype(jnp.bfloat16), w4_ref[...],
                preferred_element_type=jnp.float32) + b4_ref[...]
    # sigmoid = 1 / (1 + exp(-o)): exp on the EUP, approx reciprocal also on
    # the EUP -> keeps the TBxDp epilogue off the VALU critical path.
    s = pl.reciprocal(1.0 + jnp.exp(-o), approx=True)
    out_ref[...] = s.astype(out_ref.dtype)   # bf16 writeback (halves out DMA)


@functools.partial(
    jax.jit,
    static_argnames=("height", "width", "color_channel", "latent_dim"))
def ae_forward(x, params, *, height, width, color_channel, latent_dim):
    """x: (B, C, H, W) float32. Returns (output (B, C, H, W) f32, latent (B, latent_dim) f32)."""
    B = x.shape[0]
    D = height * width * color_channel

    w1, b1, w2, b2, w3, b3, w4, b4 = params  # lane-padded; weights bf16, biases f32
    Dp = w1.shape[0]     # padded flattened-input dim (multiple of 128)
    Hp = w1.shape[1]     # padded hidden dim
    Lp = w2.shape[1]     # padded latent dim

    TB = _choose_tb(B)
    Bp = _round_up(B, TB)

    # Flatten to bf16; pad only when needed (fast path avoids a full HBM copy).
    x_flat = x.reshape(B, D).astype(jnp.bfloat16)
    if Bp == B and Dp == D:
        x_pad = x_flat
    else:
        x_pad = jnp.pad(x_flat, ((0, Bp - B), (0, Dp - D)))

    grid = (Bp // TB,)
    tile_map = lambda i: (i, 0)   # x / out / latent tiles advance with the grid
    const_map = lambda i: (0, 0)  # weights & biases stay resident in VMEM

    out_pad, lat_pad = pl.pallas_call(
        _ae_kernel,
        out_shape=(
            jax.ShapeDtypeStruct((Bp, Dp), jnp.bfloat16),
            jax.ShapeDtypeStruct((Bp, Lp), jnp.float32),
        ),
        grid=grid,
        in_specs=[
            pl.BlockSpec((TB, Dp), tile_map),    # x (bf16, streams per batch tile)
            pl.BlockSpec((Dp, Hp), const_map),   # w1 (bf16)
            pl.BlockSpec((1, Hp), const_map),    # b1 (f32)
            pl.BlockSpec((Hp, Lp), const_map),   # w2 (bf16)
            pl.BlockSpec((1, Lp), const_map),    # b2 (f32)
            pl.BlockSpec((Lp, Hp), const_map),   # w3 (bf16)
            pl.BlockSpec((1, Hp), const_map),    # b3 (f32)
            pl.BlockSpec((Hp, Dp), const_map),   # w4 (bf16)
            pl.BlockSpec((1, Dp), const_map),    # b4 (f32)
        ],
        out_specs=(
            pl.BlockSpec((TB, Dp), tile_map),    # reconstruction (bf16)
            pl.BlockSpec((TB, Lp), tile_map),    # latent (f32, lane-padded)
        ),
        compiler_params=pltpu.CompilerParams(
            dimension_semantics=("parallel",)),  # megacore-shard batch tiles (v7x)
    )(x_pad, w1, b1, w2, b2, w3, b3, w4, b4)

    output = out_pad[:B, :D].astype(jnp.float32).reshape(B, -1, height, width)
    latent = lat_pad[:B, :latent_dim]
    return output, latent


def init_ae_params(key, D, hidden_dim, latent_dim):
    """torch.nn.Linear-style init U(-1/sqrt(fan_in), 1/sqrt(fan_in)), stored as
    (in, out) so the kernel computes x @ W + b, zero-padded to lane-dense
    shapes.  Weights are bf16 (MXU inputs); biases stay f32 (VPU epilogue).
    Zero padding is exact: padded rows/cols/biases are 0 and ReLU(0)=0."""
    Dp = _round_up(D, _LANE)
    Hp = _round_up(hidden_dim, _LANE)
    Lp = _round_up(latent_dim, _LANE)

    def linear(k, fan_in, fan_out, pad_in, pad_out):
        kw, kb = jax.random.split(k)
        bound = 1.0 / (fan_in ** 0.5)
        w = jax.random.uniform(kw, (fan_in, fan_out), jnp.float32, -bound, bound)
        b = jax.random.uniform(kb, (1, fan_out), jnp.float32, -bound, bound)
        wp = jnp.zeros((pad_in, pad_out), jnp.float32).at[:fan_in, :fan_out].set(w)
        bp = jnp.zeros((1, pad_out), jnp.float32).at[:, :fan_out].set(b)
        return wp.astype(jnp.bfloat16), bp

    k1, k2, k3, k4 = jax.random.split(key, 4)
    w1, b1 = linear(k1, D, hidden_dim, Dp, Hp)          # enc Linear 1
    w2, b2 = linear(k2, hidden_dim, latent_dim, Hp, Lp) # enc Linear 2
    w3, b3 = linear(k3, latent_dim, hidden_dim, Lp, Hp) # dec Linear 1
    w4, b4 = linear(k4, hidden_dim, D, Hp, Dp)          # dec Linear 2
    return (w1, b1, w2, b2, w3, b3, w4, b4)


def _ae_reference(x, params, *, height, width, color_channel, latent_dim):
    """Pure-JAX reference with the same mixed-precision scheme (for validation).
    Note: bf16 weights/activations deviate from a strict f32 torch AE by ~1e-2
    relative; within the stated tolerance but not bit-exact."""
    B = x.shape[0]
    D = height * width * color_channel
    w1, b1, w2, b2, w3, b3, w4, b4 = params
    Dp = w1.shape[0]
    xf = jnp.zeros((B, Dp), jnp.float32).at[:, :D].set(x.reshape(B, D))
    xb = xf.astype(jnp.bfloat16)
    h1 = jnp.maximum(jnp.dot(xb, w1, preferred_element_type=jnp.float32) + b1, 0.0)
    z = jnp.maximum(jnp.dot(h1.astype(jnp.bfloat16), w2,
                            preferred_element_type=jnp.float32) + b2, 0.0)
    h2 = jnp.maximum(jnp.dot(z.astype(jnp.bfloat16), w3,
                             preferred_element_type=jnp.float32) + b3, 0.0)
    o = jax.nn.sigmoid(jnp.dot(h2.astype(jnp.bfloat16), w4,
                               preferred_element_type=jnp.float32) + b4)
    o = o.astype(jnp.bfloat16).astype(jnp.float32)
    return o[:, :D].reshape(B, -1, height, width), z[:, :latent_dim]


if __name__ == "__main__":
    # small config consistent with the module
    batch = 2
    color_channel = 4
    height = 16
    width = 16
    hidden_dim = 32
    latent_dim = 16
    D = height * width * color_channel  # 1024

    key = jax.random.PRNGKey(0)
    kx, kp = jax.random.split(key)

    x = jax.random.uniform(kx, (batch, color_channel, height, width), jnp.float32)
    params = init_ae_params(kp, D, hidden_dim, latent_dim)

    output, latent = ae_forward(
        x, params, height=height, width=width,
        color_channel=color_channel, latent_dim=latent_dim)
    jax.block_until_ready((output, latent))

    assert output.shape == (batch, color_channel, height, width), output.shape
    assert latent.shape == (batch, latent_dim), latent.shape
    assert bool(jnp.all(jnp.isfinite(output))) and bool(jnp.all(jnp.isfinite(latent)))
    # bf16 writeback can round values very close to 1 up to exactly 1.0
    assert bool(jnp.all((output >= 0.0) & (output <= 1.0)))   # sigmoid range
    assert bool(jnp.all(latent >= 0.0))                       # ReLU range

    # numerical check vs pure-JAX reference (same mixed precision)
    ref_out, ref_lat = _ae_reference(
        x, params, height=height, width=width,
        color_channel=color_channel, latent_dim=latent_dim)
    assert jnp.allclose(output, ref_out, atol=2e-2, rtol=2e-2)
    assert jnp.allclose(latent, ref_lat, atol=2e-2, rtol=2e-2)

    print("KERNEL_OK")
</pallas_src>

<mosaic_0001>
module attributes {stable_mosaic.version = 11 : i64} {
  func.func @_ae_kernel(%arg0: i32, %arg1: memref<16x1024xbf16, #tpu.memory_space<vmem>>, %arg2: memref<1024x128xbf16, #tpu.memory_space<vmem>>, %arg3: memref<1x128xf32, #tpu.memory_space<vmem>>, %arg4: memref<128x128xbf16, #tpu.memory_space<vmem>>, %arg5: memref<1x128xf32, #tpu.memory_space<vmem>>, %arg6: memref<128x128xbf16, #tpu.memory_space<vmem>>, %arg7: memref<1x128xf32, #tpu.memory_space<vmem>>, %arg8: memref<128x1024xbf16, #tpu.memory_space<vmem>>, %arg9: memref<1x1024xf32, #tpu.memory_space<vmem>>, %arg10: memref<16x1024xbf16, #tpu.memory_space<vmem>>, %arg11: memref<16x128xf32, #tpu.memory_space<vmem>>) attributes {dimension_semantics = [#tpu.dimension_semantics<parallel>], iteration_bounds = array<i64: 1>, scalar_prefetch = 0 : i64, scratch_operands = 0 : i64, tpu.core_type = #tpu.core_type<tc>, window_params = [{transform_indices = @transform_0, window_bounds = array<i64: 16, 1024>}, {pipeline_mode = #tpu.pipeline_mode<synchronous>, transform_indices = @transform_1, window_bounds = array<i64: 1024, 128>}, {pipeline_mode = #tpu.pipeline_mode<synchronous>, transform_indices = @transform_2, window_bounds = array<i64: 1, 128>}, {pipeline_mode = #tpu.pipeline_mode<synchronous>, transform_indices = @transform_3, window_bounds = array<i64: 128, 128>}, {pipeline_mode = #tpu.pipeline_mode<synchronous>, transform_indices = @transform_4, window_bounds = array<i64: 1, 128>}, {pipeline_mode = #tpu.pipeline_mode<synchronous>, transform_indices = @transform_5, window_bounds = array<i64: 128, 128>}, {pipeline_mode = #tpu.pipeline_mode<synchronous>, transform_indices = @transform_6, window_bounds = array<i64: 1, 128>}, {pipeline_mode = #tpu.pipeline_mode<synchronous>, transform_indices = @transform_7, window_bounds = array<i64: 128, 1024>}, {pipeline_mode = #tpu.pipeline_mode<synchronous>, transform_indices = @transform_8, window_bounds = array<i64: 1, 1024>}, {transform_indices = @transform_9, window_bounds = array<i64: 16, 1024>}, {transform_indices = @transform_10, window_bounds = array<i64: 16, 128>}]} {
    %c0 = arith.constant 0 : index
    %c0_0 = arith.constant 0 : index
    %0 = vector.load %arg1[%c0, %c0_0] : memref<16x1024xbf16, #tpu.memory_space<vmem>>, vector<16x1024xbf16>
    %c0_1 = arith.constant 0 : index
    %c0_2 = arith.constant 0 : index
    %1 = vector.load %arg2[%c0_1, %c0_2] : memref<1024x128xbf16, #tpu.memory_space<vmem>>, vector<1024x128xbf16>
    %cst = arith.constant dense<0.000000e+00> : vector<16x128xf32>
    %2 = tpu.matmul %0, %1, %cst {dimension_numbers = #tpu.dot_dimension_numbers<[1], [0], [0], [1], [0, 0, 1, 1], [], []>} : vector<16x1024xbf16>, vector<1024x128xbf16>, vector<16x128xf32> -> vector<16x128xf32>
    %c0_3 = arith.constant 0 : index
    %c0_4 = arith.constant 0 : index
    %3 = vector.load %arg3[%c0_3, %c0_4] : memref<1x128xf32, #tpu.memory_space<vmem>>, vector<1x128xf32>
    %4 = vector.broadcast %3 : vector<1x128xf32> to vector<16x128xf32>
    %5 = arith.addf %2, %4 : vector<16x128xf32>
    %cst_5 = arith.constant 0.000000e+00 : f32
    %6 = vector.broadcast %cst_5 : f32 to vector<16x128xf32>
    %7 = arith.maximumf %5, %6 : vector<16x128xf32>
    %8 = arith.truncf %7 : vector<16x128xf32> to vector<16x128xbf16>
    %c0_6 = arith.constant 0 : index
    %c0_7 = arith.constant 0 : index
    %9 = vector.load %arg4[%c0_6, %c0_7] : memref<128x128xbf16, #tpu.memory_space<vmem>>, vector<128x128xbf16>
    %cst_8 = arith.constant dense<0.000000e+00> : vector<16x128xf32>
    %10 = tpu.matmul %8, %9, %cst_8 {dimension_numbers = #tpu.dot_dimension_numbers<[1], [0], [0], [1], [0, 0, 1, 1], [], []>} : vector<16x128xbf16>, vector<128x128xbf16>, vector<16x128xf32> -> vector<16x128xf32>
    %c0_9 = arith.constant 0 : index
    %c0_10 = arith.constant 0 : index
    %11 = vector.load %arg5[%c0_9, %c0_10] : memref<1x128xf32, #tpu.memory_space<vmem>>, vector<1x128xf32>
    %12 = vector.broadcast %11 : vector<1x128xf32> to vector<16x128xf32>
    %13 = arith.addf %10, %12 : vector<16x128xf32>
    %cst_11 = arith.constant 0.000000e+00 : f32
    %14 = vector.broadcast %cst_11 : f32 to vector<16x128xf32>
    %15 = arith.maximumf %13, %14 : vector<16x128xf32>
    %c0_12 = arith.constant 0 : index
    %c0_13 = arith.constant 0 : index
    %16 = vector.load %arg11[%c0_12, %c0_13] : memref<16x128xf32, #tpu.memory_space<vmem>>, vector<16x128xf32>
    tpu.vector_store %arg11[%c0_12, %c0_13], %15 {strides = array<i32>} : memref<16x128xf32, #tpu.memory_space<vmem>>, vector<16x128xf32>,
    %17 = arith.truncf %15 : vector<16x128xf32> to vector<16x128xbf16>
    %c0_14 = arith.constant 0 : index
    %c0_15 = arith.constant 0 : index
    %18 = vector.load %arg6[%c0_14, %c0_15] : memref<128x128xbf16, #tpu.memory_space<vmem>>, vector<128x128xbf16>
    %cst_16 = arith.constant dense<0.000000e+00> : vector<16x128xf32>
    %19 = tpu.matmul %17, %18, %cst_16 {dimension_numbers = #tpu.dot_dimension_numbers<[1], [0], [0], [1], [0, 0, 1, 1], [], []>} : vector<16x128xbf16>, vector<128x128xbf16>, vector<16x128xf32> -> vector<16x128xf32>
    %c0_17 = arith.constant 0 : index
    %c0_18 = arith.constant 0 : index
    %20 = vector.load %arg7[%c0_17, %c0_18] : memref<1x128xf32, #tpu.memory_space<vmem>>, vector<1x128xf32>
    %21 = vector.broadcast %20 : vector<1x128xf32> to vector<16x128xf32>
    %22 = arith.addf %19, %21 : vector<16x128xf32>
    %cst_19 = arith.constant 0.000000e+00 : f32
    %23 = vector.broadcast %cst_19 : f32 to vector<16x128xf32>
    %24 = arith.maximumf %22, %23 : vector<16x128xf32>
    %25 = arith.truncf %24 : vector<16x128xf32> to vector<16x128xbf16>
    %c0_20 = arith.constant 0 : index
    %c0_21 = arith.constant 0 : index
    %26 = vector.load %arg8[%c0_20, %c0_21] : memref<128x1024xbf16, #tpu.memory_space<vmem>>, vector<128x1024xbf16>
    %cst_22 = arith.constant dense<0.000000e+00> : vector<16x1024xf32>
    %27 = tpu.matmul %25, %26, %cst_22 {dimension_numbers = #tpu.dot_dimension_numbers<[1], [0], [0], [1], [0, 0, 1, 1], [], []>} : vector<16x128xbf16>, vector<128x1024xbf16>, vector<16x1024xf32> -> vector<16x1024xf32>
    %c0_23 = arith.constant 0 : index
    %c0_24 = arith.constant 0 : index
    %28 = vector.load %arg9[%c0_23, %c0_24] : memref<1x1024xf32, #tpu.memory_space<vmem>>, vector<1x1024xf32>
    %29 = vector.broadcast %28 : vector<1x1024xf32> to vector<16x1024xf32>
    %30 = arith.addf %27, %29 : vector<16x1024xf32>
    %cst_25 = arith.constant 0.000000e+00 : f32
    %31 = vector.broadcast %cst_25 : f32 to vector<16x1024xf32>
    %32 = arith.subf %31, %30 : vector<16x1024xf32>
    %33 = math.exp %32 : vector<16x1024xf32>
    %cst_26 = arith.constant 1.000000e+00 : f32
    %34 = vector.broadcast %cst_26 : f32 to vector<16x1024xf32>
    %35 = arith.addf %34, %33 : vector<16x1024xf32>
    %36 = tpu.reciprocal %35 {approx = true} : vector<16x1024xf32> -> vector<16x1024xf32>
    %37 = arith.truncf %36 : vector<16x1024xf32> to vector<16x1024xbf16>
    %c0_27 = arith.constant 0 : index
    %c0_28 = arith.constant 0 : index
    %38 = vector.load %arg10[%c0_27, %c0_28] : memref<16x1024xbf16, #tpu.memory_space<vmem>>, vector<16x1024xbf16>
    tpu.vector_store %arg10[%c0_27, %c0_28], %37 {strides = array<i32>} : memref<16x1024xbf16, #tpu.memory_space<vmem>>, vector<16x1024xbf16>,
    return
  }
  func.func @transform_0(%arg0: i32) -> (i32, i32) {
    %c0_i32 = arith.constant 0 : i32
    %c0_i32_0 = arith.constant 0 : i32
    return %arg0, %c0_i32 : i32, i32
  }
  func.func @transform_1(%arg0: i32) -> (i32, i32) {
    %c0_i32 = arith.constant 0 : i32
    %c0_i32_0 = arith.constant 0 : i32
    %c0_i32_1 = arith.constant 0 : i32
    return %c0_i32, %c0_i32_0 : i32, i32
  }
  func.func @transform_2(%arg0: i32) -> (i32, i32) {
    %c0_i32 = arith.constant 0 : i32
    %c0_i32_0 = arith.constant 0 : i32
    %c0_i32_1 = arith.constant 0 : i32
    return %c0_i32, %c0_i32_0 : i32, i32
  }
  func.func @transform_3(%arg0: i32) -> (i32, i32) {
    %c0_i32 = arith.constant 0 : i32
    %c0_i32_0 = arith.constant 0 : i32
    %c0_i32_1 = arith.constant 0 : i32
    return %c0_i32, %c0_i32_0 : i32, i32
  }
  func.func @transform_4(%arg0: i32) -> (i32, i32) {
    %c0_i32 = arith.constant 0 : i32
    %c0_i32_0 = arith.constant 0 : i32
    %c0_i32_1 = arith.constant 0 : i32
    return %c0_i32, %c0_i32_0 : i32, i32
  }
  func.func @transform_5(%arg0: i32) -> (i32, i32) {
    %c0_i32 = arith.constant 0 : i32
    %c0_i32_0 = arith.constant 0 : i32
    %c0_i32_1 = arith.constant 0 : i32
    return %c0_i32, %c0_i32_0 : i32, i32
  }
  func.func @transform_6(%arg0: i32) -> (i32, i32) {
    %c0_i32 = arith.constant 0 : i32
    %c0_i32_0 = arith.constant 0 : i32
    %c0_i32_1 = arith.constant 0 : i32
    return %c0_i32, %c0_i32_0 : i32, i32
  }
  func.func @transform_7(%arg0: i32) -> (i32, i32) {
    %c0_i32 = arith.constant 0 : i32
    %c0_i32_0 = arith.constant 0 : i32
    %c0_i32_1 = arith.constant 0 : i32
    return %c0_i32, %c0_i32_0 : i32, i32
  }
  func.func @transform_8(%arg0: i32) -> (i32, i32) {
    %c0_i32 = arith.constant 0 : i32
    %c0_i32_0 = arith.constant 0 : i32
    %c0_i32_1 = arith.constant 0 : i32
    return %c0_i32, %c0_i32_0 : i32, i32
  }
  func.func @transform_9(%arg0: i32) -> (i32, i32) {
    %c0_i32 = arith.constant 0 : i32
    %c0_i32_0 = arith.constant 0 : i32
    return %arg0, %c0_i32 : i32, i32
  }
  func.func @transform_10(%arg0: i32) -> (i32, i32) {
    %c0_i32 = arith.constant 0 : i32
    %c0_i32_0 = arith.constant 0 : i32
    return %arg0, %c0_i32 : i32, i32
  }
}

</mosaic_0001>

<bundles_post_ra>
// kernel: ae_forward.1
= control target key start
LH: loop header
LB: loop body
LE: loop exit
PB: predicated region body
PF: predicated region fallthrough
CT: control target
= control target key end

     0   :  { %16 = vsyncpa [#allocation3], 0  ;;  %s2637_s0 = inlined_call_operand.vmem [shape: bf16[16,1024], index: 0, kind: input, shape index: {}]   ;;  %s2638_s1 = inlined_call_operand.hbm [shape: bf16[1024,128], index: 1, kind: input, shape index: {}]   ;;  %s2639_s2 = inlined_call_operand.vmem [shape: f32[1,128], index: 2, kind: input, shape index: {}]   ;;  %s2640_s3 = inlined_call_operand.vmem [shape: bf16[128,128], index: 3, kind: input, shape index: {}]   ;;  %s2641_s4 = inlined_call_operand.vmem [shape: f32[1,128], index: 4, kind: input, shape index: {}]   ;;  %s2642_s5 = inlined_call_operand.vmem [shape: bf16[128,128], index: 5, kind: input, shape index: {}]   ;;  %s2643_s6 = inlined_call_operand.vmem [shape: f32[1,128], index: 6, kind: input, shape index: {}]   ;;  %s2644_s7 = inlined_call_operand.hbm [shape: bf16[128,1024], index: 7, kind: input, shape index: {}]   ;;  %s2645_s8 = inlined_call_operand.vmem [shape: f32[1,1024], index: 8, kind: input, shape index: {}]   ;;  %s2646_s9 = inlined_call_operand.vmem [shape: bf16[16,1024], index: 9, kind: output, shape index: {0}]   ;;  %s2647_s10 = inlined_call_operand.vmem [shape: f32[16,128], index: 10, kind: output, shape index: {1}]  }
   0x1   :  { %s24_s15 = sshll.u32 %s2638_s1, 4  ;;  %s25_s15 = int_to_ptr.hbm [resolvable:$true] %s24_s15 }
   0x2   :  { %17 = vsyncpa [#allocation5], 0  ;;  %s2422_s16 = smov [#allocation2]   ;;  %s47_s20 = sshll.u32 %s2644_s7, 4  ;;  %s48_s20 = int_to_ptr.hbm [resolvable:$true] %s47_s20 }
   0x3   :  { %s26_s17 = sshll.u32 %s2422_s16, 4  ;;  %s2423_s21 = smov 64   ;;  %s27_s17 = int_to_ptr.vmem [resolvable:$true] %s26_s17 }
   0x4   :  { %s2424_s22 = smov 4   ;;  %s2425_s23 = smov [#allocation4]  }
   0x5   :  { %32 = dma.hbm_to_vmem [thread:$0]  %s25_s15, 8192, %s27_s17, [#allocation3], %s2423_s21, %s2423_s21, %s2424_s22  }
   0x6   :  { %s49_s24 = sshll.u32 %s2425_s23, 4  ;;  %s2426_s25 = smov 512   ;;  %s50_s24 = int_to_ptr.vmem [resolvable:$true] %s49_s24 }
   0x7   :  { %s2427_s26 = smov 32  }
   0x8   :  { %55 = dma.hbm_to_vmem [thread:$0]  %s48_s20, 8192, %s50_s24, [#allocation5], %s2426_s25, %s2426_s25, %s2427_s26  }
   0x9   :  { %2418 = dma.done.wait [#allocation3], 8192  }
   0xa   :  { %2419 = vsyncadd [#allocation3], 4294959104 }
   0xb   :  { %2420 = dma.done.wait [#allocation5], 8192  }
   0xc   :  { %2421 = vsyncadd [#allocation5], 4294959104  ;;  %v2160_v0 = vld [vmem:[#allocation2 + $0x38] sm:$0xff]  ;;  %v2159_v4 = vld [vmem:[#allocation2 + $0x30] sm:$0xff] }
   0xd   :  { %v2168_v1 = vld [vmem:[#allocation2 + $0x78] sm:$0xff]  ;;  %630 = vmatpush.bf16.msra.mxu0 %v2160_v0  ;;  %v2167_v5 = vld [vmem:[#allocation2 + $0x70] sm:$0xff]  ;;  %v2158_v8 = vld [vmem:[#allocation2 + $0x28] sm:$0xff] }
   0xe   :  { %v2176_v2 = vld [vmem:[#allocation2 + $0xb8] sm:$0xff]  ;;  %644 = vmatpush.bf16.msra.mxu1 %v2168_v1  ;;  %v2175_v6 = vld [vmem:[#allocation2 + $0xb0] sm:$0xff]  ;;  %v2166_v9 = vld [vmem:[#allocation2 + $0x68] sm:$0xff] }
   0xf   :  { %v2184_v3 = vld [vmem:[#allocation2 + $0xf8] sm:$0xff]  ;;  %658 = vmatpush.bf16.msra.mxu2 %v2176_v2  ;;  %v2183_v7 = vld [vmem:[#allocation2 + $0xf0] sm:$0xff]  ;;  %v2174_v10 = vld [vmem:[#allocation2 + $0xa8] sm:$0xff] }
  0x10   :  { %672 = vmatpush.bf16.msra.mxu3 %v2184_v3  ;;  %v2182_v11 = vld [vmem:[#allocation2 + $0xe8] sm:$0xff]  ;;  %v2157_v12 = vld [vmem:[#allocation2 + $0x20] sm:$0xff]  ;;  %v2156_v16 = vld [vmem:[#allocation2 + $0x18] sm:$0xff] }
  0x11   :  { %631 = vmatpush.bf16.msra.mxu0 %v2159_v4  ;;  %v2165_v13 = vld [vmem:[#allocation2 + $0x60] sm:$0xff]  ;;  %v2164_v17 = vld [vmem:[#allocation2 + $0x58] sm:$0xff]  ;;  %v2155_v20 = vld [vmem:[#allocation2 + $0x10] sm:$0xff] }
  0x12   :  { %645 = vmatpush.bf16.msra.mxu1 %v2167_v5  ;;  %v2173_v14 = vld [vmem:[#allocation2 + $0xa0] sm:$0xff]  ;;  %v2172_v18 = vld [vmem:[#allocation2 + $0x98] sm:$0xff]  ;;  %v2163_v21 = vld [vmem:[#allocation2 + $0x50] sm:$0xff] }
  0x13   :  { %659 = vmatpush.bf16.msra.mxu2 %v2175_v6  ;;  %v2181_v15 = vld [vmem:[#allocation2 + $0xe0] sm:$0xff]  ;;  %v2180_v19 = vld [vmem:[#allocation2 + $0xd8] sm:$0xff]  ;;  %v2171_v22 = vld [vmem:[#allocation2 + $0x90] sm:$0xff] }
  0x14   :  { %673 = vmatpush.bf16.msra.mxu3 %v2183_v7  ;;  %v2179_v23 = vld [vmem:[#allocation2 + $0xd0] sm:$0xff]  ;;  %v2154_v24 = vld [vmem:[#allocation2 + $0x8] sm:$0xff]  ;;  %v2153_v28 = vld [vmem:[#allocation2] sm:$0xff] }
  0x15   :  { %632 = vmatpush.bf16.msra.mxu0 %v2158_v8  ;;  %v2162_v25 = vld [vmem:[#allocation2 + $0x48] sm:$0xff]  ;;  %v2161_v29 = vld [vmem:[#allocation2 + $0x40] sm:$0xff]  ;;  %v2192_v32 = vld [vmem:[#allocation2 + $0x138] sm:$0xff] }
  0x16   :  { %646 = vmatpush.bf16.msra.mxu1 %v2166_v9  ;;  %v2170_v26 = vld [vmem:[#allocation2 + $0x88] sm:$0xff]  ;;  %v2169_v30 = vld [vmem:[#allocation2 + $0x80] sm:$0xff]  ;;  %v2200_v33 = vld [vmem:[#allocation2 + $0x178] sm:$0xff] }
  0x17   :  { %660 = vmatpush.bf16.msra.mxu2 %v2174_v10  ;;  %v2178_v27 = vld [vmem:[#allocation2 + $0xc8] sm:$0xff]  ;;  %v2177_v31 = vld [vmem:[#allocation2 + $0xc0] sm:$0xff]  ;;  %v2208_v42 = vld [vmem:[#allocation2 + $0x1b8] sm:$0xff] }
  0x18   :  { %674 = vmatpush.bf16.msra.mxu3 %v2182_v11  ;;  %v1547_v34 = vld [vmem:[%s2637_s0 + $0x8] sm:$0xf]  ;;  %v1539_v36 = vld [vmem:[%s2637_s0] sm:$0xf]  ;;  %v2146_v38 = vld [vmem:[%s2637_s0 + $0xc] sm:$0xf] }
  0x19   :  { %633 = vmatpush.bf16.msra.mxu0 %v2157_v12  ;;  %v2150_v35 = vld [vmem:[%s2637_s0 + $0x24] sm:$0xf0]  ;;  %v2149_v37 = vld [vmem:[%s2637_s0 + $0x1c] sm:$0xf0]  ;;  %v1549_v39 = vld [vmem:[%s2637_s0 + $0x28] sm:$0xf0] }
  0x1a   :  { %647 = vmatpush.bf16.msra.mxu1 %v2165_v13  ;;  %v2145_v40 = vld [vmem:[%s2637_s0 + $0x4] sm:$0xf]  ;;  %v2216_v43 = vld [vmem:[#allocation2 + $0x1f8] sm:$0xff]  ;;  %v1548_v44 = vor.u32 %v2150_v35, %v1547_v34  ;;  %v1540_v45 = vor.u32 %v2149_v37, %v1539_v36  ;;  %v1552_v46 = vor.u32 %v2146_v38, %v1549_v39  ;;  %v2191_v48 = vld [vmem:[#allocation2 + $0x130] sm:$0xff] }
  0x1b   :  { %661 = vmatpush.bf16.msra.mxu2 %v2173_v14  ;;  %v1541_v41 = vld [vmem:[%s2637_s0 + $0x20] sm:$0xf0]  ;;  %v2199_v49 = vld [vmem:[#allocation2 + $0x170] sm:$0xff]  ;;  %v2190_v52 = vld [vmem:[#allocation2 + $0x128] sm:$0xff] }
  0x1c   :  { %675 = vmatpush.bf16.msra.mxu3 %v2181_v15  ;;  %v1544_v47 = vor.u32 %v2145_v40, %v1541_v41  ;;  %v2207_v50 = vld [vmem:[#allocation2 + $0x1b0] sm:$0xff]  ;;  %v2198_v53 = vld [vmem:[#allocation2 + $0x168] sm:$0xff]  ;;  %v2189_v56 = vld [vmem:[#allocation2 + $0x120] sm:$0xff] }
  0x1d   :  { %634 = vmatpush.bf16.msra.mxu0 %v2156_v16  ;;  %v2215_v51 = vld [vmem:[#allocation2 + $0x1f0] sm:$0xff]  ;;  %v2206_v54 = vld [vmem:[#allocation2 + $0x1a8] sm:$0xff]  ;;  %v2197_v57 = vld [vmem:[#allocation2 + $0x160] sm:$0xff] }
  0x1e   :  { %648 = vmatpush.bf16.msra.mxu1 %v2164_v17  ;;  %v2214_v55 = vld [vmem:[#allocation2 + $0x1e8] sm:$0xff]  ;;  %v2205_v58 = vld [vmem:[#allocation2 + $0x1a0] sm:$0xff]  ;;  %v2188_v60 = vld [vmem:[#allocation2 + $0x118] sm:$0xff] }
  0x1f   :  { %662 = vmatpush.bf16.msra.mxu2 %v2172_v18  ;;  %v2213_v59 = vld [vmem:[#allocation2 + $0x1e0] sm:$0xff]  ;;  %v2196_v61 = vld [vmem:[#allocation2 + $0x158] sm:$0xff]  ;;  %v2187_v0 = vld [vmem:[#allocation2 + $0x110] sm:$0xff] }
  0x20   :  { %676 = vmatpush.bf16.msra.mxu3 %v2180_v19  ;;  %v2204_v62 = vld [vmem:[#allocation2 + $0x198] sm:$0xff]  ;;  %v2195_v1 = vld [vmem:[#allocation2 + $0x150] sm:$0xff]  ;;  %v2186_v4 = vld [vmem:[#allocation2 + $0x108] sm:$0xff] }
  0x21   :  { %635 = vmatpush.bf16.msra.mxu0 %v2155_v20  ;;  %v2212_v63 = vld [vmem:[#allocation2 + $0x1d8] sm:$0xff]  ;;  %v2203_v2 = vld [vmem:[#allocation2 + $0x190] sm:$0xff]  ;;  %v2194_v5 = vld [vmem:[#allocation2 + $0x148] sm:$0xff] }
  0x22   :  { %649 = vmatpush.bf16.msra.mxu1 %v2163_v21  ;;  %v2211_v3 = vld [vmem:[#allocation2 + $0x1d0] sm:$0xff]  ;;  %v2202_v6 = vld [vmem:[#allocation2 + $0x188] sm:$0xff]  ;;  %v2185_v8 = vld [vmem:[#allocation2 + $0x100] sm:$0xff] }
  0x23   :  { %663 = vmatpush.bf16.msra.mxu2 %v2171_v22  ;;  %v2210_v7 = vld [vmem:[#allocation2 + $0x1c8] sm:$0xff]  ;;  %v2193_v9 = vld [vmem:[#allocation2 + $0x140] sm:$0xff]  ;;  %v1555_v12 = vld [vmem:[%s2637_s0 + $0x10] sm:$0xf] }
  0x24   :  { %677 = vmatpush.bf16.msra.mxu3 %v2179_v23  ;;  %v2201_v10 = vld [vmem:[#allocation2 + $0x180] sm:$0xff]  ;;  %v2151_v13 = vld [vmem:[%s2637_s0 + $0x2c] sm:$0xf0]  ;;  %v2147_v14 = vld [vmem:[%s2637_s0 + $0x14] sm:$0xf] }
  0x25   :  { %636 = vmatpush.bf16.msra.mxu0 %v2154_v24  ;;  %v2209_v11 = vld [vmem:[#allocation2 + $0x1c0] sm:$0xff]  ;;  %v1557_v15 = vld [vmem:[%s2637_s0 + $0x30] sm:$0xf0]  ;;  %v1563_v16 = vld [vmem:[%s2637_s0 + $0x18] sm:$0xf]  ;;  %v1556_v20 = vor.u32 %v2151_v13, %v1555_v12 }
  0x26   :  { %650 = vmatpush.bf16.msra.mxu1 %v2162_v25  ;;  %v2152_v17 = vld [vmem:[%s2637_s0 + $0x34] sm:$0xf0]  ;;  %v2148_v18 = vld [vmem:[%s2637_s0 + $0x1c] sm:$0xf]  ;;  %v1560_v21 = vor.u32 %v2147_v14, %v1557_v15  ;;  %v2223_v25 = vld [vmem:[%s2640_s3 + $0x30] sm:$0xff] }
  0x27   :  { %664 = vmatpush.bf16.msra.mxu2 %v2170_v26  ;;  %v1565_v19 = vld [vmem:[%s2637_s0 + $0x38] sm:$0xf0]  ;;  %v1564_v22 = vor.u32 %v2152_v17, %v1563_v16  ;;  %v2222_v26 = vld [vmem:[%s2640_s3 + $0x28] sm:$0xff]  ;;  %v2303_v34 = vld [vmem:[%s2639_s2] ss:$0 sm:$0xff] }
  0x28   :  { %678 = vmatpush.bf16.msra.mxu3 %v2178_v27  ;;  %v1568_v23 = vor.u32 %v2148_v18, %v1565_v19  ;;  %v2224_v24 = vld [vmem:[%s2640_s3 + $0x38] sm:$0xff]  ;;  %v2221_v27 = vld [vmem:[%s2640_s3 + $0x20] sm:$0xff]  ;;  %v2231_v40 = vld [vmem:[%s2642_s5 + $0x30] sm:$0xff] }
  0x29   :  { %637 = vmatpush.bf16.msra.mxu0 %v2153_v28  ;;  %v2220_v28 = vld [vmem:[%s2640_s3 + $0x18] sm:$0xff]  ;;  %v2115_v12 = vld [vmem:[#allocation4 + $0x1c0] sm:$0xf]  ;;  %v2289_v14 = vld [vmem:[#allocation4 + $0x1c4] sm:$0xf] }
  0x2a   :  { %651 = vmatpush.bf16.msra.mxu1 %v2161_v29  ;;  %v2219_v29 = vld [vmem:[%s2640_s3 + $0x10] sm:$0xff]  ;;  %v2232_v39 = vld [vmem:[%s2642_s5 + $0x38] sm:$0xff]  ;;  %v2293_v13 = vld [vmem:[#allocation4 + $0x1dc] sm:$0xf0] }
  0x2b   :  { %665 = vmatpush.bf16.msra.mxu2 %v2169_v30  ;;  %v2116_v15 = vor.u32 %v2293_v13, %v2115_v12  ;;  %v2117_v16 = vld [vmem:[#allocation4 + $0x1e0] sm:$0xf0]  ;;  %v2123_v17 = vld [vmem:[#allocation4 + $0x1c8] sm:$0xf] }
  0x2c   :  { %679 = vmatpush.bf16.msra.mxu3 %v2177_v31  ;;  %638 = vmatmul.bf16.vlgmr.msra.gmra.mxu0 %v1540_v45  ;;  %v2218_v31 = vld [vmem:[%s2640_s3 + $0x8] sm:$0xff]  ;;  %v2120_v19 = vor.u32 %v2289_v14, %v2117_v16  ;;  %v1957_v13 = vld [vmem:[#allocation4 + $0xa0] sm:$0xf0] }
  0x2d   :  { %686 = vmatpush.bf16.msrb.mxu0 %v2192_v32  ;;  %652 = vmatmul.bf16.vlgmr.msra.gmra.mxu1 %v1544_v47  ;;  %v2294_v18 = vld [vmem:[#allocation4 + $0x1e4] sm:$0xf0] }
  0x2e   :  { %700 = vmatpush.bf16.msrb.mxu1 %v2200_v33  ;;  %666 = vmatmul.bf16.vlgmr.msra.gmra.mxu2 %v1548_v44  ;;  %v2217_v33 = vld [vmem:[%s2640_s3] sm:$0xff]  ;;  %v2230_v44 = vld [vmem:[%s2642_s5 + $0x28] sm:$0xff] }
  0x2f   :  { %714 = vmatpush.bf16.msrb.mxu2 %v2208_v42  ;;  %680 = vmatmul.bf16.vlgmr.msra.gmra.mxu3 %v1552_v46  ;;  %v1963_v14 = vld [vmem:[#allocation4 + $0x88] sm:$0xf] }
  0x30   :  { %728 = vmatpush.bf16.msrb.mxu3 %v2216_v43 }
  0x31   :  { %687 = vmatpush.bf16.msrb.mxu0 %v2191_v48 }
  0x32   :  { %701 = vmatpush.bf16.msrb.mxu1 %v2199_v49 }
  0x33   :  { %715 = vmatpush.bf16.msrb.mxu2 %v2207_v50  ;;  %v2229_v50 = vld [vmem:[%s2642_s5 + $0x20] sm:$0xff] }
  0x34   :  { %729 = vmatpush.bf16.msrb.mxu3 %v2215_v51 }
  0x35   :  { %688 = vmatpush.bf16.msrb.mxu0 %v2190_v52 }
  0x36   :  { %702 = vmatpush.bf16.msrb.mxu1 %v2198_v53 }
  0x37   :  { %716 = vmatpush.bf16.msrb.mxu2 %v2206_v54 }
  0x38   :  { %730 = vmatpush.bf16.msrb.mxu3 %v2214_v55 }
  0x39   :  { %689 = vmatpush.bf16.msrb.mxu0 %v2189_v56 }
  0x3a   :  { %703 = vmatpush.bf16.msrb.mxu1 %v2197_v57 }
  0x3b   :  { %717 = vmatpush.bf16.msrb.mxu2 %v2205_v58 }
  0x3c   :  { %731 = vmatpush.bf16.msrb.mxu3 %v2213_v59 }
  0x3d   :  { %690 = vmatpush.bf16.msrb.mxu0 %v2188_v60 }
  0x3e   :  { %704 = vmatpush.bf16.msrb.mxu1 %v2196_v61 }
  0x3f   :  { %718 = vmatpush.bf16.msrb.mxu2 %v2204_v62 }
  0x40   :  { %732 = vmatpush.bf16.msrb.mxu3 %v2212_v63 }
  0x41   :  { %691 = vmatpush.bf16.msrb.mxu0 %v2187_v0 }
  0x42   :  { %705 = vmatpush.bf16.msrb.mxu1 %v2195_v1 }
  0x43   :  { %719 = vmatpush.bf16.msrb.mxu2 %v2203_v2 }
  0x44   :  { %733 = vmatpush.bf16.msrb.mxu3 %v2211_v3 }
  0x45   :  { %692 = vmatpush.bf16.msrb.mxu0 %v2186_v4 }
  0x46   :  { %706 = vmatpush.bf16.msrb.mxu1 %v2194_v5 }
  0x47   :  { %720 = vmatpush.bf16.msrb.mxu2 %v2202_v6 }
  0x48   :  { %734 = vmatpush.bf16.msrb.mxu3 %v2210_v7 }
  0x49   :  { %693 = vmatpush.bf16.msrb.mxu0 %v2185_v8  ;;  %v2228_v8 = vld [vmem:[%s2642_s5 + $0x18] sm:$0xff] }
  0x4a   :  { %707 = vmatpush.bf16.msrb.mxu1 %v2193_v9  ;;  %v2227_v9 = vld [vmem:[%s2642_s5 + $0x10] sm:$0xff] }
  0x4b   :  { %721 = vmatpush.bf16.msrb.mxu2 %v2201_v10  ;;  %v2226_v10 = vld [vmem:[%s2642_s5 + $0x8] sm:$0xff] }
  0x4c   :  { %735 = vmatpush.bf16.msrb.mxu3 %v2209_v11  ;;  %694 = vmatmul.bf16.vlgmr.msrb.gmra.mxu0 %v1556_v20  ;;  %v2225_v11 = vld [vmem:[%s2642_s5] sm:$0xff]  ;;  %v2124_v20 = vor.u32 %v2294_v18, %v2123_v17  ;;  %v2250_v17 = vld [vmem:[#allocation4 + $0x8c] sm:$0xf] }
  0x4d   :  { %708 = vmatmul.bf16.vlgmr.msrb.gmra.mxu1 %v1560_v21  ;;  %813 = vmatpush.bf16.msra.mxu0 %v2224_v24  ;;  %v2290_v21 = vld [vmem:[#allocation4 + $0x1cc] sm:$0xf] }
  0x4e   :  { %722 = vmatmul.bf16.vlgmr.msrb.gmra.mxu2 %v1564_v22  ;;  %900 = vmatpush.bf16.msra.mxu1 %v2232_v39  ;;  %v2125_v22 = vld [vmem:[#allocation4 + $0x1e8] sm:$0xf0]  ;;  %v2053_v39 = vld [vmem:[#allocation4 + $0x160] sm:$0xf0] }
  0x4f   :  { %736 = vmatmul.bf16.vlgmr.msrb.gmra.mxu3 %v1568_v23  ;;  %v2083_v23 = vld [vmem:[#allocation4 + $0x180] sm:$0xf]  ;;  %1319 = vmatpush.bf16.msra.mxu2 %v2116_v15  ;;  %v2128_v24 = vor.u32 %v2290_v21, %v2125_v22  ;;  %v2254_v15 = vld [vmem:[#allocation4 + $0xa4] sm:$0xf0]  ;;  %v1965_v18 = vld [vmem:[#allocation4 + $0xa8] sm:$0xf0] }
  0x50   :  { %1333 = vmatpush.bf16.msra.mxu3 %v2120_v19 }
  0x51   :  { %814 = vmatpush.bf16.msra.mxu0 %v2223_v25  ;;  %v2285_v25 = vld [vmem:[#allocation4 + $0x19c] sm:$0xf0] }
  0x52   :  { %901 = vmatpush.bf16.msra.mxu1 %v2231_v40  ;;  %v2059_v40 = vld [vmem:[#allocation4 + $0x148] sm:$0xf] }
  0x55   :  { %815 = vmatpush.bf16.msra.mxu0 %v2222_v26  ;;  %v2281_v26 = vld [vmem:[#allocation4 + $0x184] sm:$0xf] }
  0x56   :  { %902 = vmatpush.bf16.msra.mxu1 %v2230_v44  ;;  %v2061_v44 = vld [vmem:[#allocation4 + $0x168] sm:$0xf0] }
  0x59   :  { %816 = vmatpush.bf16.msra.mxu0 %v2221_v27  ;;  %v2085_v27 = vld [vmem:[#allocation4 + $0x1a0] sm:$0xf0] }
  0x5a   :  { %903 = vmatpush.bf16.msra.mxu1 %v2229_v50 }
  0x5d   :  { %817 = vmatpush.bf16.msra.mxu0 %v2220_v28  ;;  %v2084_v28 = vor.u32 %v2285_v25, %v2083_v23  ;;  %v1964_v23 = vor.u32 %v2254_v15, %v1963_v14  ;;  %v2241_v25 = vld [vmem:[#allocation4 + $0x44] sm:$0xf]  ;;  %v2275_v14 = vld [vmem:[#allocation4 + $0x154] sm:$0xf] }
  0x5e   :  { %904 = vmatpush.bf16.msra.mxu1 %v2228_v8  ;;  %v1955_v8 = vld [vmem:[#allocation4 + $0x80] sm:$0xf] }
  0x5f   :  { %1320 = vmatpush.bf16.msra.mxu2 %v2084_v28  ;;  %v1931_v28 = vld [vmem:[#allocation4 + $0x48] sm:$0xf] }
  0x61   :  { %818 = vmatpush.bf16.msra.mxu0 %v2219_v29  ;;  %v2088_v29 = vor.u32 %v2281_v26, %v2085_v27  ;;  %v1968_v26 = vor.u32 %v2250_v17, %v1965_v18  ;;  %v1925_v27 = vld [vmem:[#allocation4 + $0x60] sm:$0xf0]  ;;  %v2075_v17 = vld [vmem:[#allocation4 + $0x158] sm:$0xf] }
  0x62   :  { %905 = vmatpush.bf16.msra.mxu1 %v2227_v9  ;;  %v2253_v9 = vld [vmem:[#allocation4 + $0x9c] sm:$0xf0]  ;;  %v2280_v18 = vld [vmem:[#allocation4 + $0x174] sm:$0xf0] }
  0x63   :  { %1334 = vmatpush.bf16.msra.mxu3 %v2088_v29  ;;  %v1956_v19 = vor.u32 %v2253_v9, %v1955_v8  ;;  %v2246_v29 = vld [vmem:[#allocation4 + $0x64] sm:$0xf0]  ;;  %v2284_v9 = vld [vmem:[#allocation4 + $0x19c] sm:$0xf] }
  0x65   :  { %819 = vmatpush.bf16.msra.mxu0 %v2218_v31  ;;  %v2286_v31 = vld [vmem:[#allocation4 + $0x1a4] sm:$0xf0] }
  0x66   :  { %906 = vmatpush.bf16.msra.mxu1 %v2226_v10  ;;  %v2249_v10 = vld [vmem:[#allocation4 + $0x84] sm:$0xf] }
  0x67   :  { %v1960_v22 = vor.u32 %v2249_v10, %v1957_v13  ;;  %v2109_v10 = vld [vmem:[#allocation4 + $0x1b8] sm:$0xf0]  ;;  %v2279_v13 = vld [vmem:[#allocation4 + $0x16c] sm:$0xf0] }
  0x69   :  { %820 = vmatpush.bf16.msra.mxu0 %v2217_v33 }
  0x6a   :  { %907 = vmatpush.bf16.msra.mxu1 %v2225_v11 }
  0x6d   :  { %1347 = vmatpush.bf16.msrb.mxu0 %v2124_v20  ;;  %v1923_v20 = vld [vmem:[#allocation4 + $0x40] sm:$0xf] }
  0x6e   :  { %1361 = vmatpush.bf16.msrb.mxu1 %v2128_v24  ;;  %v2245_v24 = vld [vmem:[#allocation4 + $0x5c] sm:$0xf0] }
  0xa9   :  { %v639_v30 = vpop.f32.mrf.mxu0 }
  0xaa   :  { %v653_v32 = vpop.f32.mrf.mxu1  ;;  %v640_v37 = vadd.f32 %v2303_v34, %v639_v30  ;;  %v2091_v30 = vld [vmem:[#allocation4 + $0x188] sm:$0xf] }
  0xab   :  { %v2092_v33 = vor.u32 %v2286_v31, %v2091_v30  ;;  %v2242_v30 = vld [vmem:[#allocation4 + $0x4c] sm:$0xf] }
  0xac   :  { %v654_v42 = vadd.f32 %v653_v32, %v640_v37  ;;  %v2282_v32 = vld [vmem:[#allocation4 + $0x18c] sm:$0xf] }
  0xad   :  { %1348 = vmatpush.bf16.msrb.mxu0 %v2092_v33  ;;  %v1933_v31 = vld [vmem:[#allocation4 + $0x68] sm:$0xf0]  ;;  %v1928_v33 = vor.u32 %v2241_v25, %v1925_v27  ;;  %v2271_v25 = vld [vmem:[#allocation4 + $0x12c] sm:$0xf0] }
  0xb1   :  { %v667_v35 = vpop.f32.mrf.mxu2  ;;  %v641_v38 = vpop.f32.mrf.mxu0 }
  0xb2   :  { %v681_v36 = vpop.f32.mrf.mxu3  ;;  %v655_v41 = vpop.f32.mrf.mxu1  ;;  %v642_v43 = vadd.f32 %v2303_v34, %v641_v38  ;;  %v668_v47 = vadd.f32 %v667_v35, %v654_v42  ;;  %v2093_v34 = vld [vmem:[#allocation4 + $0x1a8] sm:$0xf0]  ;;  %v2051_v35 = vld [vmem:[#allocation4 + $0x140] sm:$0xf]  ;;  %v2273_v38 = vld [vmem:[#allocation4 + $0x144] sm:$0xf] }
  0xb3   :  { %v2096_v37 = vor.u32 %v2282_v32, %v2093_v34  ;;  %v2278_v42 = vld [vmem:[#allocation4 + $0x164] sm:$0xf0]  ;;  %v1924_v32 = vor.u32 %v2245_v24, %v1923_v20  ;;  %v1932_v34 = vor.u32 %v2246_v29, %v1931_v28  ;;  %v2076_v20 = vor.u32 %v2280_v18, %v2075_v17  ;;  %v2035_v24 = vld [vmem:[#allocation4 + $0x110] sm:$0xf]  ;;  %v2037_v28 = vld [vmem:[#allocation4 + $0x130] sm:$0xf0] }
  0xb4   :  { %v656_v48 = vadd.f32 %v655_v41, %v642_v43  ;;  %v682_v52 = vadd.f32 %v681_v36, %v668_v47  ;;  %v2277_v36 = vld [vmem:[#allocation4 + $0x15c] sm:$0xf0]  ;;  %v2274_v43 = vld [vmem:[#allocation4 + $0x14c] sm:$0xf]  ;;  %v2036_v27 = vor.u32 %v2271_v25, %v2035_v24  ;;  %v2043_v29 = vld [vmem:[#allocation4 + $0x118] sm:$0xf] }
  0xb5   :  { %v2052_v41 = vor.u32 %v2277_v36, %v2051_v35  ;;  %v2019_v47 = vld [vmem:[#allocation4 + $0x100] sm:$0xf]  ;;  %1362 = vmatpush.bf16.msrb.mxu1 %v2096_v37  ;;  %v2064_v50 = vor.u32 %v2274_v43, %v2061_v44  ;;  %v2238_v43 = vld [vmem:[#allocation4 + $0x24] sm:$0xf0]  ;;  %v2234_v44 = vld [vmem:[#allocation4 + $0xc] sm:$0xf] }
  0xb6   :  { %v1891_v35 = vld [vmem:[#allocation4] sm:$0xf] }
  0xb7   :  { %1321 = vmatpush.bf16.msra.mxu2 %v2052_v41  ;;  %v2237_v36 = vld [vmem:[#allocation4 + $0x1c] sm:$0xf0]  ;;  %v1899_v41 = vld [vmem:[#allocation4 + $0x8] sm:$0xf] }
  0xb9   :  { %v669_v45 = vpop.f32.mrf.mxu2  ;;  %1363 = vmatpush.bf16.msrb.mxu1 %v2064_v50 }
  0xba   :  { %v683_v46 = vpop.f32.mrf.mxu3  ;;  %v670_v53 = vadd.f32 %v669_v45, %v656_v48  ;;  %v2056_v45 = vor.u32 %v2273_v38, %v2053_v39  ;;  %v2269_v48 = vld [vmem:[#allocation4 + $0x11c] sm:$0xf0]  ;;  %v1936_v38 = vor.u32 %v2242_v30, %v1933_v31  ;;  %v2233_v39 = vld [vmem:[#allocation4 + $0x4] sm:$0xf]  ;;  %v2272_v30 = vld [vmem:[#allocation4 + $0x134] sm:$0xf0] }
  0xbc   :  { %v684_v57 = vadd.f32 %v683_v46, %v670_v53  ;;  %v2060_v46 = vor.u32 %v2278_v42, %v2059_v40  ;;  %v2270_v53 = vld [vmem:[#allocation4 + $0x124] sm:$0xf0]  ;;  %1335 = vmatpush.bf16.msra.mxu3 %v2056_v45  ;;  %v1893_v40 = vld [vmem:[#allocation4 + $0x20] sm:$0xf0]  ;;  %v1901_v45 = vld [vmem:[#allocation4 + $0x28] sm:$0xf0] }
  0xbd   :  { %v1904_v50 = vor.u32 %v2234_v44, %v1901_v45  ;;  %v2260_v45 = vld [vmem:[#allocation4 + $0xdc] sm:$0xf] }
  0xbe   :  { %1349 = vmatpush.bf16.msrb.mxu0 %v2060_v46  ;;  %v1892_v46 = vor.u32 %v2237_v36, %v1891_v35  ;;  %v2003_v36 = vld [vmem:[#allocation4 + $0xd0] sm:$0xf] }
  0xc9   :  { %v695_v49 = vpop.f32.mrf.mxu0 }
  0xca   :  { %v709_v51 = vpop.f32.mrf.mxu1  ;;  %v696_v54 = vadd.f32 %v695_v49, %v682_v52  ;;  %v2265_v49 = vld [vmem:[#allocation4 + $0x104] sm:$0xf]  ;;  %v2027_v52 = vld [vmem:[#allocation4 + $0x108] sm:$0xf] }
  0xcc   :  { %v710_v59 = vadd.f32 %v709_v51, %v696_v54  ;;  %v2021_v51 = vld [vmem:[#allocation4 + $0x120] sm:$0xf0]  ;;  %v2266_v54 = vld [vmem:[#allocation4 + $0x10c] sm:$0xf] }
  0xd1   :  { %v723_v55 = vpop.f32.mrf.mxu2  ;;  %v697_v58 = vpop.f32.mrf.mxu0 }
  0xd2   :  { %v737_v56 = vpop.f32.mrf.mxu3  ;;  %v698_v60 = vadd.f32 %v697_v58, %v684_v57  ;;  %v724_v61 = vadd.f32 %v723_v55, %v710_v59  ;;  %v711_v62 = vpop.f32.mrf.mxu1  ;;  %v2029_v55 = vld [vmem:[#allocation4 + $0x128] sm:$0xf0]  ;;  %v2024_v57 = vor.u32 %v2265_v49, %v2021_v51  ;;  %v2028_v58 = vor.u32 %v2270_v53, %v2027_v52  ;;  %v1987_v59 = vld [vmem:[#allocation4 + $0xc0] sm:$0xf]  ;;  %v2131_v52 = vld [vmem:[#allocation4 + $0x1d0] sm:$0xf] }
  0xd3   :  { %v1900_v49 = vor.u32 %v2238_v43, %v1899_v41  ;;  %v2295_v53 = vld [vmem:[#allocation4 + $0x1ec] sm:$0xf0]  ;;  %v2011_v41 = vld [vmem:[#allocation4 + $0xd8] sm:$0xf] }
  0xd4   :  { %v712_v63 = vadd.f32 %v711_v62, %v698_v60  ;;  %v738_v1 = vadd.f32 %v737_v56, %v724_v61  ;;  %v2020_v56 = vor.u32 %v2269_v48, %v2019_v47  ;;  %v2261_v60 = vld [vmem:[#allocation4 + $0xdc] sm:$0xf0]  ;;  %v2257_v61 = vld [vmem:[#allocation4 + $0xc4] sm:$0xf]  ;;  %v2032_v62 = vor.u32 %v2266_v54, %v2029_v55  ;;  %1336 = vmatpush.bf16.msra.mxu3 %v2024_v57  ;;  %v2291_v54 = vld [vmem:[#allocation4 + $0x1d4] sm:$0xf] }
  0xd5   :  { %1350 = vmatpush.bf16.msrb.mxu0 %v2028_v58  ;;  %v1896_v48 = vor.u32 %v2233_v39, %v1893_v40  ;;  %v2132_v55 = vor.u32 %v2295_v53, %v2131_v52  ;;  %v2139_v57 = vld [vmem:[#allocation4 + $0x1d8] sm:$0xf]  ;;  %v2005_v40 = vld [vmem:[#allocation4 + $0xf0] sm:$0xf0] }
  0xd6   :  { %v742_v5 = vmax.f32 %v738_v1, 0.0  ;;  %v2262_v1 = vld [vmem:[#allocation4 + $0xe4] sm:$0xf0]  ;;  %1322 = vmatpush.bf16.msra.mxu2 %v2020_v56  ;;  %1364 = vmatpush.bf16.msrb.mxu1 %v2032_v62  ;;  %v2133_v56 = vld [vmem:[#allocation4 + $0x1f0] sm:$0xf0] }
  0xd7   :  { %v2296_v58 = vld [vmem:[#allocation4 + $0x1f4] sm:$0xf0]  ;;  %v2141_v62 = vld [vmem:[#allocation4 + $0x1f8] sm:$0xf0] }
  0xd9   :  { %v725_v0 = vpop.f32.mrf.mxu2 }
  0xda   :  { %v726_v2 = vadd.f32 %v725_v0, %v712_v63  ;;  %v739_v3 = vpop.f32.mrf.mxu3  ;;  %v1989_v63 = vld [vmem:[#allocation4 + $0xe0] sm:$0xf0]  ;;  %v1995_v0 = vld [vmem:[#allocation4 + $0xc8] sm:$0xf] }
  0xdc   :  { %v740_v4 = vadd.f32 %v739_v3, %v726_v2  ;;  %v2304_v2 = vld [vmem:[%s2641_s4] ss:$0 sm:$0xff]  ;;  %v2258_v3 = vld [vmem:[#allocation4 + $0xcc] sm:$0xf] }
  0xde   :  { %v743_v6 = vmax.f32 %v740_v4, 0.0  ;;  %v1997_v4 = vld [vmem:[#allocation4 + $0xe8] sm:$0xf0] }
  0xdf   :  { %v2000_v12 = vor.u32 %v2258_v3, %v1997_v4  ;;  %v2101_v4 = vld [vmem:[#allocation4 + $0x1b0] sm:$0xf0] }
  0xe0   :  { %v744_v7 = vpack.c.bf16 %v743_v6, %v742_v5  ;;  %v1988_v5 = vor.u32 %v2261_v60, %v1987_v59  ;;  %v1992_v6 = vor.u32 %v2257_v61, %v1989_v63  ;;  %v2136_v59 = vor.u32 %v2291_v54, %v2133_v56  ;;  %v2292_v61 = vld [vmem:[#allocation4 + $0x1dc] sm:$0xf]  ;;  %v1979_v54 = vld [vmem:[#allocation4 + $0x98] sm:$0xf] }
  0xe1   :  { %1365 = vmatpush.bf16.msrb.mxu1 %v2000_v12  ;;  %v2140_v60 = vor.u32 %v2296_v58, %v2139_v57  ;;  %v2144_v63 = vor.u32 %v2292_v61, %v2141_v62  ;;  %v2067_v12 = vld [vmem:[#allocation4 + $0x150] sm:$0xf]  ;;  %v2252_v56 = vld [vmem:[#allocation4 + $0x9c] sm:$0xf]  ;;  %v2243_v62 = vld [vmem:[#allocation4 + $0x54] sm:$0xf] }
  0xe2   :  { %821 = vmatmul.bf16.vlgmr.msra.gmra.mxu0 %v744_v7  ;;  %v1996_v7 = vor.u32 %v2262_v1, %v1995_v0  ;;  %1323 = vmatpush.bf16.msra.mxu2 %v1988_v5  ;;  %v2099_v0 = vld [vmem:[#allocation4 + $0x190] sm:$0xf]  ;;  %v2107_v5 = vld [vmem:[#allocation4 + $0x198] sm:$0xf]  ;;  %v2068_v15 = vor.u32 %v2279_v13, %v2067_v12  ;;  %v1981_v58 = vld [vmem:[#allocation4 + $0xb8] sm:$0xf0] }
  0xe3   :  { %1337 = vmatpush.bf16.msra.mxu3 %v1992_v6  ;;  %v2287_v1 = vld [vmem:[#allocation4 + $0x1ac] sm:$0xf0]  ;;  %v2288_v6 = vld [vmem:[#allocation4 + $0x1b4] sm:$0xf0]  ;;  %v1984_v61 = vor.u32 %v2252_v56, %v1981_v58 }
  0xe4   :  { %1351 = vmatpush.bf16.msrb.mxu0 %v1996_v7  ;;  %v2100_v3 = vor.u32 %v2287_v1, %v2099_v0  ;;  %v2108_v8 = vor.u32 %v2288_v6, %v2107_v5  ;;  %v1947_v0 = vld [vmem:[#allocation4 + $0x58] sm:$0xf] }
  0xe5   :  { %1366 = vmatpush.bf16.msrb.mxu1 %v1968_v26  ;;  %v2267_v26 = vld [vmem:[#allocation4 + $0x114] sm:$0xf]  ;;  %v1915_v12 = vld [vmem:[#allocation4 + $0x18] sm:$0xf] }
  0xe6   :  { %1324 = vmatpush.bf16.msra.mxu2 %v1956_v19  ;;  %v2040_v31 = vor.u32 %v2267_v26, %v2037_v28  ;;  %v2240_v13 = vld [vmem:[#allocation4 + $0x34] sm:$0xf0]  ;;  %v2603_v28 = vld [vmem:[%s2645_s8] sm:$0xff] }
  0xe7   :  { %1338 = vmatpush.bf16.msra.mxu3 %v1960_v22  ;;  %v2077_v22 = vld [vmem:[#allocation4 + $0x178] sm:$0xf0]  ;;  %v1916_v18 = vor.u32 %v2240_v13, %v1915_v12  ;;  %v988_v12 = vperm.slane %v2603_v28, 5 }
  0xe8   :  { %1352 = vmatpush.bf16.msrb.mxu0 %v1964_v23 }
  0xe9   :  { %1367 = vmatpush.bf16.msrb.mxu1 %v1936_v38  ;;  %v2259_v38 = vld [vmem:[#allocation4 + $0xd4] sm:$0xf] }
  0xea   :  { %1325 = vmatpush.bf16.msra.mxu2 %v1924_v32  ;;  %v2044_v32 = vor.u32 %v2272_v30, %v2043_v29  ;;  %v2008_v43 = vor.u32 %v2259_v38, %v2005_v40  ;;  %v985_v29 = vperm.slane %v2603_v28, 2  ;;  %v986_v30 = vperm.slane %v2603_v28, 3 }
  0xeb   :  { %1339 = vmatpush.bf16.msra.mxu3 %v1928_v33  ;;  %v2268_v33 = vld [vmem:[#allocation4 + $0x11c] sm:$0xf] }
  0xec   :  { %1353 = vmatpush.bf16.msrb.mxu0 %v1932_v34  ;;  %v2045_v34 = vld [vmem:[#allocation4 + $0x138] sm:$0xf0] }
  0xed   :  { %1368 = vmatpush.bf16.msrb.mxu1 %v1904_v50  ;;  %v2048_v35 = vor.u32 %v2268_v33, %v2045_v34  ;;  %v2251_v50 = vld [vmem:[#allocation4 + $0x94] sm:$0xf] }
  0xee   :  { %1326 = vmatpush.bf16.msra.mxu2 %v1892_v46  ;;  %v2013_v46 = vld [vmem:[#allocation4 + $0xf8] sm:$0xf0] }
  0xef   :  { %1340 = vmatpush.bf16.msra.mxu3 %v1896_v48  ;;  %v2016_v48 = vor.u32 %v2260_v45, %v2013_v46 }
  0xf0   :  { %1354 = vmatpush.bf16.msrb.mxu0 %v1900_v49  ;;  %v2255_v49 = vld [vmem:[#allocation4 + $0xac] sm:$0xf0] }
  0xf2   :  { %1375 = vmatpush.bf16.msrb.mxu2 %v2132_v55  ;;  %v2256_v55 = vld [vmem:[#allocation4 + $0xb4] sm:$0xf0] }
  0xf3   :  { %1389 = vmatpush.bf16.msrb.mxu3 %v2136_v59  ;;  %v1980_v57 = vor.u32 %v2256_v55, %v1979_v54  ;;  %v1939_v59 = vld [vmem:[#allocation4 + $0x50] sm:$0xf] }
  0xf4   :  { %1403 = vmatpush.bf16.msra.mxu0 %v2140_v60  ;;  %v2247_v60 = vld [vmem:[#allocation4 + $0x6c] sm:$0xf0] }
  0xf5   :  { %v1940_v1 = vor.u32 %v2247_v60, %v1939_v59  ;;  %v989_v59 = vperm.slane %v2603_v28, 6  ;;  %v990_v60 = vperm.slane %v2603_v28, 7 }
  0xf6   :  { %1376 = vmatpush.bf16.msrb.mxu2 %v2100_v3  ;;  %v2244_v3 = vld [vmem:[#allocation4 + $0x5c] sm:$0xf] }
  0xf8   :  { %1404 = vmatpush.bf16.msra.mxu0 %v2108_v8  ;;  %v2239_v8 = vld [vmem:[#allocation4 + $0x2c] sm:$0xf0] }
  0xfa   :  { %1377 = vmatpush.bf16.msrb.mxu2 %v2068_v15  ;;  %v1917_v15 = vld [vmem:[#allocation4 + $0x38] sm:$0xf0] }
  0xfc   :  { %1405 = vmatpush.bf16.msra.mxu0 %v2076_v20 }
  0xfe   :  { %1378 = vmatpush.bf16.msrb.mxu2 %v2036_v27 }
 0x100   :  { %1406 = vmatpush.bf16.msra.mxu0 %v2044_v32 }
 0x15f   :  { %v822_v11 = vpop.f32.mrf.mxu0 }
 0x160   :  { %v823_v16 = vadd.f32 %v2304_v2, %v822_v11  ;;  %v2112_v11 = vor.u32 %v2284_v9, %v2109_v10  ;;  %v2235_v9 = vld [vmem:[#allocation4 + $0x14] sm:$0xf] }
 0x162   :  { %v827_v21 = vmax.f32 %v823_v16, 0.0  ;;  %v2069_v16 = vld [vmem:[#allocation4 + $0x170] sm:$0xf0] }
 0x163   :  { %v2072_v19 = vor.u32 %v2275_v14, %v2069_v16  ;;  %v2236_v14 = vld [vmem:[#allocation4 + $0x1c] sm:$0xf] }
 0x164   :  { %829 = vst [vmem:[%s2647_s10] sm:$0xff] %v827_v21 }
 0x167   :  { %v824_v37 = vpop.f32.mrf.mxu0 }
 0x168   :  { %v825_v42 = vadd.f32 %v2304_v2, %v824_v37  ;;  %v2283_v2 = vld [vmem:[#allocation4 + $0x194] sm:$0xf]  ;;  %v2263_v37 = vld [vmem:[#allocation4 + $0xec] sm:$0xf0] }
 0x169   :  { %v2104_v7 = vor.u32 %v2283_v2, %v2101_v4  ;;  %v2004_v39 = vor.u32 %v2263_v37, %v2003_v36  ;;  %v2248_v2 = vld [vmem:[#allocation4 + $0x74] sm:$0xf0]  ;;  %v1949_v4 = vld [vmem:[#allocation4 + $0x78] sm:$0xf0]  ;;  %v984_v36 = vperm.slane %v2603_v28, 1 }
 0x16a   :  { %v828_v47 = vmax.f32 %v825_v42, 0.0  ;;  %v2264_v42 = vld [vmem:[#allocation4 + $0xf4] sm:$0xf0]  ;;  %v1948_v6 = vor.u32 %v2248_v2, %v1947_v0  ;;  %v1952_v10 = vor.u32 %v2244_v3, %v1949_v4 }
 0x16b   :  { %1390 = vmatpush.bf16.msrb.mxu3 %v2104_v7  ;;  %v2012_v44 = vor.u32 %v2264_v42, %v2011_v41  ;;  %1379 = vmatpush.bf16.msrb.mxu2 %v2004_v39  ;;  %v1907_v7 = vld [vmem:[#allocation4 + $0x10] sm:$0xf] }
 0x16c   :  { %830 = vst [vmem:[%s2647_s10 + $0x8] sm:$0xff] %v828_v47  ;;  %v831_v51 = vpack.c.bf16 %v828_v47, %v827_v21  ;;  %v2276_v21 = vld [vmem:[#allocation4 + $0x15c] sm:$0xf]  ;;  %v1971_v47 = vld [vmem:[#allocation4 + $0x90] sm:$0xf]  ;;  %v1908_v16 = vor.u32 %v2239_v8, %v1907_v7 }
 0x16d   :  { %v2080_v23 = vor.u32 %v2276_v21, %v2077_v22  ;;  %1407 = vmatpush.bf16.msra.mxu0 %v2012_v44  ;;  %v1972_v52 = vor.u32 %v2255_v49, %v1971_v47  ;;  %v2305_v21 = vld [vmem:[%s2643_s6] ss:$0 sm:$0xff] }
 0x16e   :  { %908 = vmatmul.bf16.vlgmr.msra.gmra.mxu1 %v831_v51  ;;  %v1973_v51 = vld [vmem:[#allocation4 + $0xb0] sm:$0xf0] }
 0x16f   :  { %1417 = vmatpush.bf16.msra.mxu1 %v2144_v63  ;;  %1391 = vmatpush.bf16.msrb.mxu3 %v2072_v19  ;;  %v1976_v53 = vor.u32 %v2251_v50, %v1973_v51  ;;  %v1941_v63 = vld [vmem:[#allocation4 + $0x70] sm:$0xf0]  ;;  %v1920_v19 = vor.u32 %v2236_v14, %v1917_v15 }
 0x170   :  { %1380 = vmatpush.bf16.msrb.mxu2 %v1972_v52  ;;  %v1944_v5 = vor.u32 %v2243_v62, %v1941_v63 }
 0x171   :  { %1408 = vmatpush.bf16.msra.mxu0 %v1980_v57 }
 0x173   :  { %1418 = vmatpush.bf16.msra.mxu1 %v2112_v11  ;;  %1392 = vmatpush.bf16.msrb.mxu3 %v2040_v31  ;;  %v1909_v11 = vld [vmem:[#allocation4 + $0x30] sm:$0xf0] }
 0x174   :  { %1381 = vmatpush.bf16.msrb.mxu2 %v1940_v1  ;;  %v1912_v17 = vor.u32 %v2235_v9, %v1909_v11  ;;  %v987_v11 = vperm.slane %v2603_v28, 4 }
 0x175   :  { %1409 = vmatpush.bf16.msra.mxu0 %v1948_v6 }
 0x177   :  { %1419 = vmatpush.bf16.msra.mxu1 %v2080_v23  ;;  %1393 = vmatpush.bf16.msrb.mxu3 %v2008_v43 }
 0x178   :  { %1382 = vmatpush.bf16.msrb.mxu2 %v1908_v16 }
 0x179   :  { %1410 = vmatpush.bf16.msra.mxu0 %v1916_v18 }
 0x17b   :  { %1420 = vmatpush.bf16.msra.mxu1 %v2048_v35  ;;  %1394 = vmatpush.bf16.msrb.mxu3 %v1976_v53  ;;  %v983_v35 = vperm.slane %v2603_v28, 0 }
 0x17f   :  { %1421 = vmatpush.bf16.msra.mxu1 %v2016_v48  ;;  %1395 = vmatpush.bf16.msrb.mxu3 %v1944_v5 }
 0x183   :  { %1422 = vmatpush.bf16.msra.mxu1 %v1984_v61  ;;  %1396 = vmatpush.bf16.msrb.mxu3 %v1912_v17 }
 0x187   :  { %1423 = vmatpush.bf16.msra.mxu1 %v1952_v10 }
 0x18b   :  { %1424 = vmatpush.bf16.msra.mxu1 %v1920_v19 }
 0x1eb   :  { %v909_v20 = vpop.f32.mrf.mxu1 }
 0x1ec   :  { %v910_v22 = vadd.f32 %v2305_v21, %v909_v20 }
 0x1ee   :  { %v914_v25 = vmax.f32 %v910_v22, 0.0 }
 0x1f3   :  { %v911_v23 = vpop.f32.mrf.mxu1 }
 0x1f4   :  { %v912_v24 = vadd.f32 %v2305_v21, %v911_v23 }
 0x1f6   :  { %v915_v26 = vmax.f32 %v912_v24, 0.0 }
 0x1f8   :  { %v916_v27 = vpack.c.bf16 %v915_v26, %v914_v25 }
 0x1fa   :  { %1327 = vmatmul.bf16.vlgmr.msra.gmra.mxu2 %v916_v27  ;;  %1341 = vmatmul.bf16.vlgmr.msra.gmra.mxu3 %v916_v27 }
 0x1fb   :  { %1355 = vmatmul.bf16.vlgmr.msrb.gmra.mxu0 %v916_v27  ;;  %1369 = vmatmul.bf16.vlgmr.msrb.gmra.mxu1 %v916_v27 }
 0x20a   :  { %1383 = vmatmul.bf16.vlgmr.msrb.gmra.mxu2 %v916_v27  ;;  %1397 = vmatmul.bf16.vlgmr.msrb.gmra.mxu3 %v916_v27 }
 0x20b   :  { %1411 = vmatmul.bf16.vlgmr.msra.gmra.mxu0 %v916_v27  ;;  %1425 = vmatmul.bf16.vlgmr.msra.gmra.mxu1 %v916_v27 }
 0x278   :  { %v1356_v31 = vpop.f32.mrf.mxu0  ;;  %v1370_v32 = vpop.f32.mrf.mxu1 }
 0x279   :  { %v1357_v33 = vadd.f32 %v1356_v31, %v985_v29  ;;  %v1371_v34 = vadd.f32 %v1370_v32, %v986_v30 }
 0x27b   :  { %v1433_v37 = vsub.f32 0.0, %v1357_v33  ;;  %v1434_v38 = vsub.f32 0.0, %v1371_v34 }
 0x27d   :  { %v1451_v39 = vmul.f32 1.442695, %v1433_v37  ;;  %v1453_v40 = vmul.f32 1.442695, %v1434_v38  ;;  %v1328_v41 = vpop.f32.mrf.mxu2  ;;  %v1342_v42 = vpop.f32.mrf.mxu3 }
 0x27e   :  { %v1329_v43 = vadd.f32 %v1328_v41, %v983_v35  ;;  %v1343_v44 = vadd.f32 %v1342_v42, %v984_v36 }
 0x27f   :  { %2306 = vpow2.f32 %v1451_v39 }
 0x280   :  { %2308 = vpow2.f32 %v1453_v40  ;;  %v1431_v45 = vsub.f32 0.0, %v1329_v43  ;;  %v1432_v46 = vsub.f32 0.0, %v1343_v44  ;;  %v1358_v47 = vpop.f32.mrf.mxu0  ;;  %v1372_v48 = vpop.f32.mrf.mxu1 }
 0x281   :  { %v1359_v49 = vadd.f32 %v1358_v47, %v985_v29  ;;  %v1373_v50 = vadd.f32 %v1372_v48, %v986_v30 }
 0x282   :  { %v1447_v51 = vmul.f32 1.442695, %v1431_v45  ;;  %v1449_v52 = vmul.f32 1.442695, %v1432_v46 }
 0x283   :  { %v1441_v53 = vsub.f32 0.0, %v1359_v49  ;;  %v1442_v54 = vsub.f32 0.0, %v1373_v50 }
 0x284   :  { %2310 = vpow2.f32 %v1447_v51 }
 0x285   :  { %v2307_v55 = vpop.eup %2306  ;;  %2312 = vpow2.f32 %v1449_v52  ;;  %v1467_v56 = vmul.f32 1.442695, %v1441_v53  ;;  %v1330_v57 = vpop.f32.mrf.mxu2  ;;  %v1469_v63 = vmul.f32 1.442695, %v1442_v54 }
 0x286   :  { %v1344_v58 = vpop.f32.mrf.mxu3  ;;  %v2309_v61 = vpop.eup %2308  ;;  %v1481_v62 = vadd.f32 1.0, %v2307_v55  ;;  %v1331_v0 = vadd.f32 %v1330_v57, %v983_v35 }
 0x287   :  { %v1345_v1 = vadd.f32 %v1344_v58, %v984_v36  ;;  %v1482_v2 = vadd.f32 1.0, %v2309_v61  ;;  %2314 = vpow2.f32 %v1467_v56 }
 0x288   :  { %2316 = vrcp.f32 %v1481_v62  ;;  %v1439_v3 = vsub.f32 0.0, %v1331_v0  ;;  %v1412_v5 = vpop.f32.mrf.mxu0  ;;  %v1426_v6 = vpop.f32.mrf.mxu1 }
 0x289   :  { %v1440_v4 = vsub.f32 0.0, %v1345_v1  ;;  %2318 = vrcp.f32 %v1482_v2  ;;  %v1413_v7 = vadd.f32 %v1412_v5, %v989_v59  ;;  %v1427_v8 = vadd.f32 %v1426_v6, %v990_v60 }
 0x28a   :  { %v2311_v9 = vpop.eup %2310  ;;  %2320 = vpow2.f32 %v1469_v63  ;;  %v1463_v10 = vmul.f32 1.442695, %v1439_v3 }
 0x28b   :  { %v2313_v13 = vpop.eup %2312  ;;  %v1479_v14 = vadd.f32 1.0, %v2311_v9  ;;  %v1465_v15 = vmul.f32 1.442695, %v1440_v4  ;;  %v1437_v16 = vsub.f32 0.0, %v1413_v7  ;;  %v1438_v17 = vsub.f32 0.0, %v1427_v8 }
 0x28c   :  { %v1480_v18 = vadd.f32 1.0, %v2313_v13  ;;  %2322 = vpow2.f32 %v1463_v10 }
 0x28d   :  { %v2315_v19 = vpop.eup %2314  ;;  %2324 = vrcp.f32 %v1479_v14  ;;  %v1459_v20 = vmul.f32 1.442695, %v1437_v16  ;;  %v1461_v21 = vmul.f32 1.442695, %v1438_v17  ;;  %v1384_v22 = vpop.f32.mrf.mxu2 }
 0x28e   :  { %v1398_v23 = vpop.f32.mrf.mxu3  ;;  %v2317_v24 = vpop.eup %2316  ;;  %2326 = vrcp.f32 %v1480_v18  ;;  %v1489_v25 = vadd.f32 1.0, %v2315_v19  ;;  %v1385_v26 = vadd.f32 %v1384_v22, %v987_v11 }
 0x28f   :  { %v1399_v27 = vadd.f32 %v1398_v23, %v988_v12  ;;  %v2319_v29 = vpop.eup %2318  ;;  %2328 = vpow2.f32 %v1465_v15 }
 0x290   :  { %v2321_v28 = vpop.eup %2320  ;;  %v1512_v30 = vpack.c.bf16 %v2319_v29, %v2317_v24  ;;  %2330 = vrcp.f32 %v1489_v25  ;;  %v1435_v31 = vsub.f32 0.0, %v1385_v26  ;;  %v1414_v33 = vpop.f32.mrf.mxu0 }
 0x291   :  { %v1436_v32 = vsub.f32 0.0, %v1399_v27  ;;  %v1428_v34 = vpop.f32.mrf.mxu1  ;;  %v1490_v35 = vadd.f32 1.0, %v2321_v28  ;;  %2332 = vpow2.f32 %v1459_v20  ;;  %v1415_v36 = vadd.f32 %v1414_v33, %v989_v59 }
 0x292   :  { %v1429_v37 = vadd.f32 %v1428_v34, %v990_v60  ;;  %v2323_v38 = vpop.eup %2322  ;;  %1520 = vst [vmem:[%s2646_s9 + $0x8] sm:$0xff] %v1512_v30  ;;  %2334 = vpow2.f32 %v1461_v21  ;;  %v1455_v39 = vmul.f32 1.442695, %v1435_v31 }
 0x293   :  { %v1457_v40 = vmul.f32 1.442695, %v1436_v32  ;;  %v2325_v41 = vpop.eup %2324  ;;  %2336 = vrcp.f32 %v1490_v35  ;;  %v1487_v42 = vadd.f32 1.0, %v2323_v38  ;;  %v1445_v43 = vsub.f32 0.0, %v1415_v36 }
 0x294   :  { %v1446_v44 = vsub.f32 0.0, %v1429_v37  ;;  %v2327_v45 = vpop.eup %2326  ;;  %2338 = vpow2.f32 %v1455_v39 }
 0x295   :  { %v2329_v46 = vpop.eup %2328  ;;  %v1511_v47 = vpack.c.bf16 %v2327_v45, %v2325_v41  ;;  %2340 = vrcp.f32 %v1487_v42  ;;  %v1475_v48 = vmul.f32 1.442695, %v1445_v43  ;;  %v1386_v50 = vpop.f32.mrf.mxu2 }
 0x296   :  { %v1477_v49 = vmul.f32 1.442695, %v1446_v44  ;;  %v1400_v51 = vpop.f32.mrf.mxu3  ;;  %v2331_v52 = vpop.eup %2330  ;;  %v1488_v53 = vadd.f32 1.0, %v2329_v46  ;;  %2342 = vpow2.f32 %v1457_v40  ;;  %v1387_v54 = vadd.f32 %v1386_v50, %v987_v11 }
 0x297   :  { %v1401_v55 = vadd.f32 %v1400_v51, %v988_v12  ;;  %v2333_v56 = vpop.eup %2332  ;;  %1519 = vst [vmem:[%s2646_s9] sm:$0xff] %v1511_v47  ;;  %2344 = vpow2.f32 %v1475_v48 }
 0x298   :  { %v2335_v57 = vpop.eup %2334  ;;  %2346 = vrcp.f32 %v1488_v53  ;;  %v1485_v58 = vadd.f32 1.0, %v2333_v56  ;;  %v1443_v59 = vsub.f32 0.0, %v1387_v54 }
 0x299   :  { %v1444_v60 = vsub.f32 0.0, %v1401_v55  ;;  %v2337_v61 = vpop.eup %2336  ;;  %v1486_v62 = vadd.f32 1.0, %v2335_v57  ;;  %2348 = vpow2.f32 %v1477_v49 }
 0x29a   :  { %v2339_v63 = vpop.eup %2338  ;;  %v1516_v0 = vpack.c.bf16 %v2337_v61, %v2331_v52  ;;  %2350 = vrcp.f32 %v1485_v58  ;;  %v1471_v1 = vmul.f32 1.442695, %v1443_v59 }
 0x29b   :  { %v1473_v2 = vmul.f32 1.442695, %v1444_v60  ;;  %v2341_v3 = vpop.eup %2340  ;;  %2352 = vrcp.f32 %v1486_v62  ;;  %v1483_v4 = vadd.f32 1.0, %v2339_v63 }
 0x29c   :  { %v2343_v5 = vpop.eup %2342  ;;  %1524 = vst [vmem:[%s2646_s9 + $0x28] sm:$0xff] %v1516_v0  ;;  %2354 = vpow2.f32 %v1471_v1 }
 0x29d   :  { %v2345_v6 = vpop.eup %2344  ;;  %2356 = vrcp.f32 %v1483_v4  ;;  %v1484_v7 = vadd.f32 1.0, %v2343_v5 }
 0x29e   :  { %v2347_v8 = vpop.eup %2346  ;;  %v1493_v9 = vadd.f32 1.0, %v2345_v6  ;;  %2358 = vpow2.f32 %v1473_v2 }
 0x29f   :  { %v2349_v10 = vpop.eup %2348  ;;  %v1515_v11 = vpack.c.bf16 %v2347_v8, %v2341_v3  ;;  %2360 = vrcp.f32 %v1484_v7 }
 0x2a0   :  { %v2351_v12 = vpop.eup %2350  ;;  %2362 = vrcp.f32 %v1493_v9  ;;  %v1494_v13 = vadd.f32 1.0, %v2349_v10 }
 0x2a1   :  { %v2353_v14 = vpop.eup %2352  ;;  %1523 = vst [vmem:[%s2646_s9 + $0x20] sm:$0xff] %v1515_v11 }
 0x2a2   :  { %v2355_v15 = vpop.eup %2354  ;;  %v1514_v16 = vpack.c.bf16 %v2353_v14, %v2351_v12  ;;  %2364 = vrcp.f32 %v1494_v13 }
 0x2a3   :  { %v2357_v17 = vpop.eup %2356  ;;  %v1491_v18 = vadd.f32 1.0, %v2355_v15 }
 0x2a4   :  { %v2359_v19 = vpop.eup %2358  ;;  %1522 = vst [vmem:[%s2646_s9 + $0x18] sm:$0xff] %v1514_v16 }
 0x2a5   :  { %v2361_v20 = vpop.eup %2360  ;;  %2366 = vrcp.f32 %v1491_v18  ;;  %v1492_v21 = vadd.f32 1.0, %v2359_v19 }
 0x2a6   :  { %v2363_v22 = vpop.eup %2362  ;;  %v1513_v23 = vpack.c.bf16 %v2361_v20, %v2357_v17 }
 0x2a7   :  { %2368 = vrcp.f32 %v1492_v21 }
 0x2a8   :  { %v2365_v24 = vpop.eup %2364  ;;  %1521 = vst [vmem:[%s2646_s9 + $0x10] sm:$0xff] %v1513_v23 }
 0x2a9   :  { %v1518_v25 = vpack.c.bf16 %v2365_v24, %v2363_v22 }
 0x2ab   :  { %v2367_v26 = vpop.eup %2366  ;;  %1526 = vst [vmem:[%s2646_s9 + $0x38] sm:$0xff] %v1518_v25 }
 0x2ad   :  { %v2369_v27 = vpop.eup %2368 }
 0x2ae   :  { %v1517_v29 = vpack.c.bf16 %v2369_v27, %v2367_v26 }
 0x2b0   :  { %1525 = vst [vmem:[%s2646_s9 + $0x30] sm:$0xff] %v1517_v29 }
 0x2b1   :  { %1535 = vsyncpa [#allocation3], 1 }
 0x2b2   :  { %1536 = vsyncpa [#allocation5], 1 }

</bundles_post_ra>
